<compile_context>
chip_gen: v5e
topology: v5e:2x2
jax: 0.10.0
libtpu: 0.0.40
codegen_flags: <defaults>
</compile_context>

<pallas_src>
import functools

import jax
import jax.numpy as jnp
from jax.experimental import pallas as pl
from jax.experimental.pallas import tpu as pltpu

OUT_PAD = 128              # lane width: pad the output-feature axis of W^T / bias to this
MAX_ROW_TILE = 2048        # row-tile cap (multiple of 8); ~4.3 MB/step VMEM, fits v5e/v6e/v7x
SMALL_BATCH_FALLBACK = 128  # below this, a fused XLA dot beats the pallas_call fixed cost
SPLIT_BATCH = 256          # above this, keep >= 2 grid steps so v7x's 2 TCs both get work


def _round_up(x, m):
    return ((x + m - 1) // m) * m


def linear_kernel(x_ref, wt_ref, b_ref, o_ref, *, out_features):
    # (TM, IN) @ (IN, OUT_PAD) on the MXU with f32 accumulate, bias add on the
    # VPU, then store only the logical out_features columns (narrow output DMA:
    # no write amplification, no wrapper slice).
    acc = jnp.dot(x_ref[...], wt_ref[...], preferred_element_type=jnp.float32)
    acc = acc + b_ref[...]
    o_ref[...] = acc[:, :out_features].astype(o_ref.dtype)


def prepare_params(w, b, out_pad=OUT_PAD):
    """One-time prep of nn.Linear params (constants; done outside the hot path).

    w: (OUT, IN) PyTorch layout; b: (OUT,).
    Returns wt_pad: (IN, out_pad) = [W^T | 0], b_pad: (1, out_pad) = [b | 0].
    """
    out_f, in_f = w.shape
    wt_pad = jnp.zeros((in_f, out_pad), w.dtype).at[:, :out_f].set(w.T)
    b_pad = jnp.zeros((1, out_pad), b.dtype).at[0, :out_f].set(b)
    return wt_pad, b_pad


def my_model_forward(x, wt_pad, b_pad, comb=None, *, out_features=10,
                     force_pallas=False):
    """MyModel.forward: returns input @ W^T + b.

    `comb` is accepted for signature parity with the PyTorch forward but unused.
    x: (B, 100) f32; wt_pad: (100, 128) f32; b_pad: (1, 128) f32.
    """
    B, IN = x.shape
    OUT_P = wt_pad.shape[1]

    # Tiny batches: the pallas_call fixed cost (grid setup, prologue/epilogue,
    # custom-call boundary) dominates -> fused XLA dot.
    if B <= SMALL_BATCH_FALLBACK and not force_pallas:
        return (x @ wt_pad[:, :out_features]) + b_pad[0, :out_features]

    # Row tiling:
    #  - small/medium B: one full-batch tile (block dim equals full array dim).
    #  - larger B: >= 2 grid steps with TM a multiple of 8, capped at
    #    MAX_ROW_TILE, so the "parallel" axis shards across v7x's two TCs.
    if B <= SPLIT_BATCH:
        TM = B
    else:
        TM = min(MAX_ROW_TILE, _round_up(pl.cdiv(B, 2), 8))
    grid = (pl.cdiv(B, TM),)

    cost = pl.CostEstimate(
        flops=2 * B * IN * OUT_P,  # actual MXU work (padded N = 128)
        transcendentals=0,
        bytes_accessed=4 * (B * IN + IN * OUT_P + OUT_P + B * out_features),
    )

    kernel = functools.partial(linear_kernel, out_features=out_features)

    return pl.pallas_call(
        kernel,
        out_shape=jax.ShapeDtypeStruct((B, out_features), x.dtype),
        grid=grid,
        in_specs=[
            pl.BlockSpec((TM, IN), lambda i: (i, 0)),       # activations (row-tiled)
            pl.BlockSpec((IN, OUT_P), lambda i: (0, 0)),    # weight: resident, same block every step
            pl.BlockSpec((1, OUT_P), lambda i: (0, 0)),     # bias: resident, same block every step
        ],
        out_specs=pl.BlockSpec((TM, out_features), lambda i: (i, 0)),  # narrow output, no padding
        compiler_params=pltpu.CompilerParams(
            dimension_semantics=("parallel",),
        ),
        cost_estimate=cost,
    )(x, wt_pad, b_pad)


if __name__ == "__main__":
    key = jax.random.PRNGKey(0)
    k_x, k_w, k_b, k_c, k_x2 = jax.random.split(key, 5)

    IN, OUT = 100, 10

    # Deterministic parameter init (mimics nn.Linear's uniform(-1/sqrt(IN), 1/sqrt(IN))).
    bound = 1.0 / jnp.sqrt(jnp.float32(IN))
    w = jax.random.uniform(k_w, (OUT, IN), jnp.float32, -bound, bound)
    b = jax.random.uniform(k_b, (OUT,), jnp.float32, -bound, bound)

    # One-time parameter prep (transpose + lane padding of constants).
    wt_pad, b_pad = prepare_params(w, b)

    # --- Small shape implied by the module (batch=8), forced through the Pallas path.
    B = 8
    x = jax.random.normal(k_x, (B, IN), jnp.float32)
    comb = jax.random.normal(k_c, (B, IN), jnp.float32)  # unused, matches signature

    out = my_model_forward(x, wt_pad, b_pad, comb, out_features=OUT, force_pallas=True)
    out = jax.block_until_ready(out)

    ref = x @ w.T + b
    assert out.shape == (B, OUT)
    assert jnp.allclose(out, ref, atol=1e-5, rtol=1e-5)

    # Default dispatch at tiny B uses the fused-XLA fallback; must match too.
    out_fb = jax.block_until_ready(
        my_model_forward(x, wt_pad, b_pad, comb, out_features=OUT))
    assert jnp.allclose(out_fb, ref, atol=1e-5, rtol=1e-5)

    # --- Exercise the multi-step grid (>= 2 row tiles) and a partial last tile.
    B2 = 300
    x2 = jax.random.normal(k_x2, (B2, IN), jnp.float32)
    out2 = jax.block_until_ready(
        my_model_forward(x2, wt_pad, b_pad, None, out_features=OUT))
    ref2 = x2 @ w.T + b
    assert out2.shape == (B2, OUT)
    assert jnp.allclose(out2, ref2, atol=1e-5, rtol=1e-5)

    print("KERNEL_OK")
</pallas_src>

<mosaic_0001>
module attributes {stable_mosaic.version = 11 : i64} {
  func.func @linear_kernel(%arg0: i32, %arg1: memref<8x100xf32, #tpu.memory_space<vmem>>, %arg2: memref<100x128xf32, #tpu.memory_space<vmem>>, %arg3: memref<1x128xf32, #tpu.memory_space<vmem>>, %arg4: memref<8x10xf32, #tpu.memory_space<vmem>>) attributes {dimension_semantics = [#tpu.dimension_semantics<parallel>], iteration_bounds = array<i64: 1>, scalar_prefetch = 0 : i64, scratch_operands = 0 : i64, tpu.core_type = #tpu.core_type<tc>, window_params = [{transform_indices = @transform_0, window_bounds = array<i64: 8, 100>}, {pipeline_mode = #tpu.pipeline_mode<synchronous>, transform_indices = @transform_1, window_bounds = array<i64: 100, 128>}, {pipeline_mode = #tpu.pipeline_mode<synchronous>, transform_indices = @transform_2, window_bounds = array<i64: 1, 128>}, {transform_indices = @transform_3, window_bounds = array<i64: 8, 10>}]} {
    %c0 = arith.constant 0 : index
    %c0_0 = arith.constant 0 : index
    %0 = vector.load %arg1[%c0, %c0_0] : memref<8x100xf32, #tpu.memory_space<vmem>>, vector<8x100xf32>
    %c0_1 = arith.constant 0 : index
    %c0_2 = arith.constant 0 : index
    %1 = vector.load %arg2[%c0_1, %c0_2] : memref<100x128xf32, #tpu.memory_space<vmem>>, vector<100x128xf32>
    %cst = arith.constant dense<0.000000e+00> : vector<8x128xf32>
    %2 = tpu.matmul %0, %1, %cst {dimension_numbers = #tpu.dot_dimension_numbers<[1], [0], [0], [1], [0, 0, 1, 1], [], []>} : vector<8x100xf32>, vector<100x128xf32>, vector<8x128xf32> -> vector<8x128xf32>
    %c0_3 = arith.constant 0 : index
    %c0_4 = arith.constant 0 : index
    %3 = vector.load %arg3[%c0_3, %c0_4] : memref<1x128xf32, #tpu.memory_space<vmem>>, vector<1x128xf32>
    %4 = vector.broadcast %3 : vector<1x128xf32> to vector<8x128xf32>
    %5 = arith.addf %2, %4 : vector<8x128xf32>
    %6 = vector.extract_strided_slice %5 {offsets = [0, 0], sizes = [8, 10], strides = [1, 1]} : vector<8x128xf32> to vector<8x10xf32>
    %c0_5 = arith.constant 0 : index
    %c0_6 = arith.constant 0 : index
    %7 = vector.load %arg4[%c0_5, %c0_6] : memref<8x10xf32, #tpu.memory_space<vmem>>, vector<8x10xf32>
    tpu.vector_store %arg4[%c0_5, %c0_6], %6 {strides = array<i32>} : memref<8x10xf32, #tpu.memory_space<vmem>>, vector<8x10xf32>,
    return
  }
  func.func @transform_0(%arg0: i32) -> (i32, i32) {
    %c0_i32 = arith.constant 0 : i32
    %c0_i32_0 = arith.constant 0 : i32
    return %arg0, %c0_i32 : i32, i32
  }
  func.func @transform_1(%arg0: i32) -> (i32, i32) {
    %c0_i32 = arith.constant 0 : i32
    %c0_i32_0 = arith.constant 0 : i32
    %c0_i32_1 = arith.constant 0 : i32
    return %c0_i32, %c0_i32_0 : i32, i32
  }
  func.func @transform_2(%arg0: i32) -> (i32, i32) {
    %c0_i32 = arith.constant 0 : i32
    %c0_i32_0 = arith.constant 0 : i32
    %c0_i32_1 = arith.constant 0 : i32
    return %c0_i32, %c0_i32_0 : i32, i32
  }
  func.func @transform_3(%arg0: i32) -> (i32, i32) {
    %c0_i32 = arith.constant 0 : i32
    %c0_i32_0 = arith.constant 0 : i32
    return %arg0, %c0_i32 : i32, i32
  }
}

</mosaic_0001>

<bundles_post_ra>
// kernel: tpu_custom_call.1
= control target key start
LH: loop header
LB: loop body
LE: loop exit
PB: predicated region body
PF: predicated region fallthrough
CT: control target
= control target key end

     0   :  { %8 = vsyncpa [#allocation3], 0  ;;  %s234_s0 = inlined_call_operand.hbm [shape: f32[8,100], index: 0, kind: input, shape index: {}]   ;;  %s235_s1 = inlined_call_operand.hbm [shape: f32[100,128], index: 1, kind: input, shape index: {}]   ;;  %s236_s2 = inlined_call_operand.vmem [shape: f32[1,128], index: 2, kind: input, shape index: {}]   ;;  %s237_s3 = inlined_call_operand.hbm [shape: f32[8,10], index: 3, kind: output, shape index: {}]  }
   0x1   :  { %9 = vsyncpa [#allocation6], 0 }
   0x2   :  { %10 = vsyncpa [#allocation4], 0  ;;  %s16_s14 = sshll.u32 %s234_s0, 4  ;;  %s197_s15 = smov [#allocation2]   ;;  %s17_s14 = int_to_ptr.hbm [resolvable:$true] %s16_s14 }
   0x3   :  { %s18_s16 = sshll.u32 %s197_s15, 4  ;;  %s26_s19 = sshll.u32 %s235_s1, 4  ;;  %s19_s16 = int_to_ptr.vmem [resolvable:$true] %s18_s16  ;;  %s27_s19 = int_to_ptr.hbm [resolvable:$true] %s26_s19 }
   0x4   :  { %21 = dma.hbm_to_vmem [thread:$0]  %s17_s14, 128, %s19_s16, [#allocation3]  }
   0x5   :  { %s198_s20 = smov [#allocation5]   ;;  %s199_s22 = smov 128  }
   0x6   :  { %s28_s21 = sshll.u32 %s198_s20, 4  ;;  %s200_s23 = smov 8   ;;  %s29_s21 = int_to_ptr.vmem [resolvable:$true] %s28_s21 }
   0x7   :  { %34 = dma.hbm_to_vmem [thread:$0]  %s27_s19, 1664, %s29_s21, [#allocation6], %s199_s22, %s199_s22, %s200_s23  }
   0x8   :  { %191 = dma.done.wait [#allocation3], 128  }
   0x9   :  { %192 = vsyncadd [#allocation3], 4294967168 }
   0xa   :  { %193 = dma.done.wait [#allocation6], 1664  }
   0xb   :  { %194 = vsyncadd [#allocation6], 4294965632  ;;  %vm67_vm0 = vcmask 1043456   ;;  %v58_v0 = vld [vmem:[#allocation5 + $0x60] sm:$0xf]  ;;  %v57_v1 = vld [vmem:[#allocation5 + $0x58] sm:$0xff] }
   0xc   :  { %111 = vmatpush.msk.msra.mxu0 %vm67_vm0, %v58_v0  ;;  %v56_v2 = vld [vmem:[#allocation5 + $0x50] sm:$0xff]  ;;  %v55_v3 = vld [vmem:[#allocation5 + $0x48] sm:$0xff]  ;;  %v54_v4 = vld [vmem:[#allocation5 + $0x40] sm:$0xff]  ;;  %vm63_vm1 = vcmask 818176   ;;  %s201_s24 = smov [#allocation7]   ;;  %s100_s28 = sshll.u32 %s237_s3, 4  ;;  %s101_s28 = int_to_ptr.hbm [resolvable:$true] %s100_s28 }
   0xd   :  { %v53_v5 = vld [vmem:[#allocation5 + $0x38] sm:$0xff]  ;;  %v52_v6 = vld [vmem:[#allocation5 + $0x30] sm:$0xff]  ;;  %v51_v7 = vld [vmem:[#allocation5 + $0x28] sm:$0xff]  ;;  %s98_s25 = sshll.u32 %s201_s24, 4  ;;  %vm91_vm2 = vcmask 80896   ;;  %s99_s25 = int_to_ptr.vmem [resolvable:$true] %s98_s25 }
   0xe   :  { %75 = vmatpush.msra.mxu0 %v57_v1  ;;  %v50_v8 = vld [vmem:[#allocation5 + $0x20] sm:$0xff]  ;;  %v49_v9 = vld [vmem:[#allocation5 + $0x18] sm:$0xff]  ;;  %v48_v10 = vld [vmem:[#allocation5 + $0x10] sm:$0xff] }
   0xf   :  { %v47_v11 = vld [vmem:[#allocation5 + $0x8] sm:$0xff]  ;;  %v46_v12 = vld [vmem:[#allocation5] sm:$0xff]  ;;  %v45_v13 = vld [vmem:[#allocation2] sm:$0xff] }
  0x10   :  { %76 = vmatpush.msra.mxu0 %v56_v2  ;;  %v118_v14 = vld [vmem:[%s236_s2] ss:$0 sm:$0xff] }
  0x12   :  { %77 = vmatpush.msra.mxu0 %v55_v3 }
  0x14   :  { %78 = vmatpush.msra.mxu0 %v54_v4 }
  0x16   :  { %79 = vmatpush.msra.mxu0 %v53_v5 }
  0x18   :  { %80 = vmatpush.msra.mxu0 %v52_v6 }
  0x1a   :  { %81 = vmatpush.msra.mxu0 %v51_v7 }
  0x1c   :  { %82 = vmatpush.msra.mxu0 %v50_v8 }
  0x1e   :  { %83 = vmatpush.msra.mxu0 %v49_v9 }
  0x20   :  { %84 = vmatpush.msra.mxu0 %v48_v10 }
  0x22   :  { %85 = vmatpush.msra.mxu0 %v47_v11 }
  0x24   :  { %86 = vmatpush.msra.mxu0 %v46_v12 }
  0x25   :  { %112 = vmatmul.msk.f32.vlgmr.msra.gmra.mxu0 %vm63_vm1, %v45_v13 }
  0xa2   :  { %v88_v15 = vpop.f32.mrf.mxu0 }
  0xa3   :  { %v89_v16 = vadd.f32 %v118_v14, %v88_v15 }
  0xa5   :  { %92 = vst.msk [vmem:[#allocation7] sm:$0xff] %vm91_vm2, %v89_v16 }
  0xa6   :  { %103 = dma.vmem_to_hbm [thread:$0]  %s99_s25, 128, %s101_s28, [#allocation4]  }
  0xa7   :  { %195 = dma.done.wait [#allocation4], 128  }
  0xa8   :  { %196 = vsyncadd [#allocation4], 4294967168 }
  0xa9   :  { %108 = vsyncpa [#allocation3], 1 }
  0xaa   :  { %109 = vsyncpa [#allocation6], 1 }
  0xab   :  { %110 = vsyncpa [#allocation4], 1 }

</bundles_post_ra>
